<compile_context>
chip_gen: v5e
topology: v5e:2x2
jax: 0.10.0
libtpu: 0.0.40
codegen_flags: <defaults>
</compile_context>

<pallas_src>
import jax
import jax.numpy as jnp
from jax import lax
from jax.experimental import pallas as pl
from jax.experimental.pallas import tpu as pltpu


def _round_up(x, m):
    return (x + m - 1) // m * m


def _vmem_capacity_bytes():
    """Per-core VMEM capacity; conservative (v7x) default if the query fails."""
    try:
        return int(pltpu.get_tpu_info().vmem_capacity_bytes)
    except Exception:  # hardware query unavailable (e.g. AOT compile off-TPU)
        return 64 << 20


def _footprint_bytes(C, R, Vp, Dp, table_bytes=2):
    """Rough per-grid-step VMEM footprint estimate for the kernel."""
    table = 2 * Vp * Dp * table_bytes        # resident table (double-buffered)
    onehot = C * Vp * (table_bytes + 4)      # bf16 one-hot + int32 vocab iota
    wemb = C * Dp * 4                        # f32 gathered rows
    band = R * C * (4 + 4)                   # int32 col iota + f32 weighted band
    io = 2 * (C * 4 + C * 4 + 2 * R * 4 + R * Dp * 4)   # double-buffered I/O blocks
    return table + onehot + wemb + band + io


def _pick_batch_tile(B, N, M, Vp, Dp, budget, table_bytes=2):
    """Batch samples folded into one grid step.

    A tile is layout-valid if tb == B or both TB*N and TB*M are multiples of 8
    (sublane rule for the (C,1)/(R,1)/(R,Dp) blocks).  Among layout-valid
    divisors that fit the VMEM budget we prefer grid >= 2 (megacore sharding +
    DMA pipelining) provided the per-step work stays decent (C >= 256), then
    C a multiple of 256 (v6e/v7x MXU), then the largest tile.
    """
    def layout_ok(tb):
        return tb == B or ((tb * N) % 8 == 0 and (tb * M) % 8 == 0)

    def fits(tb):
        return _footprint_bytes(tb * N, tb * M, Vp, Dp, table_bytes) <= budget

    divs = [tb for tb in range(1, B + 1) if B % tb == 0 and layout_ok(tb)]
    cands = [tb for tb in divs if fits(tb)]
    if not cands:
        # Nothing fits the budget: take the smallest layout-valid tile
        # (vmem_limit_bytes is raised from the real footprint by the caller).
        return min(divs)

    multi = [tb for tb in cands if B // tb >= 2]
    pool = multi if any(tb * N >= 256 for tb in multi) else cands

    def key(tb):
        C = tb * N
        return (C % 256 == 0, C % 128 == 0, C)

    return max(pool, key=key)


def _weighted_embedding_bag_kernel(idx_ref, psw_ref, lo_ref, hi_ref, w_ref,
                                   out_ref):
    C = idx_ref.shape[0]                 # TB * N gathered rows
    R = lo_ref.shape[0]                  # TB * M output bag rows
    Vp = w_ref.shape[0]

    idx = idx_ref[...]                   # (C, 1) int32 embedding ids
    psw = psw_ref[0]                     # (1, C) f32 per-sample weights (lane-dense)
    lo = lo_ref[...]                     # (R, 1) int32 exclusive bag start (local col)
    hi = hi_ref[...]                     # (R, 1) int32 inclusive bag end   (local col)

    # Exact 0/1 one-hot over the padded vocabulary (lossless in bf16).
    vocab = lax.broadcasted_iota(jnp.int32, (C, Vp), 1)
    onehot = (vocab == idx).astype(w_ref.dtype)                     # (C, Vp) bf16

    # Row gather on the MXU in bf16 with f32 accumulation: (C, Vp) @ (Vp, Dp).
    wemb = jnp.dot(onehot, w_ref[...],
                   preferred_element_type=jnp.float32)              # (C, Dp) f32

    # Fused bag reduction: band selector with the per-sample weights folded in
    # (psw stays full f32 in the small (R, C) operand).  lo/hi already carry
    # the per-sample column base, so the band is zero outside each sample's
    # columns (prev = -1 for the first bag reproduces the padded cumsum row).
    col = lax.broadcasted_iota(jnp.int32, (R, C), 1)
    band = jnp.where((col > lo) & (col <= hi), psw, 0.0)            # (R, C) f32
    out_ref[...] = jnp.dot(band, wemb,
                           preferred_element_type=jnp.float32
                           ).astype(out_ref.dtype)                  # (R, Dp)


def weighted_embedding_bag(weight, input_ids, offsets, per_sample_weights,
                           *, batch_tile=None, table_dtype=jnp.bfloat16):
    """weight: (V, D) f32; input_ids: (B, N) int; offsets: (B, M) int
    end-of-bag indices; per_sample_weights: (B, N) f32.  Returns (B, M, D)."""
    V, D = weight.shape
    B, N = input_ids.shape
    M = offsets.shape[1]

    Vp = _round_up(V, 128)        # lane-dense one-hot (vocab on the lane axis)
    Dp = _round_up(D, 128)        # lane-dense output stores
    tbytes = jnp.dtype(table_dtype).itemsize

    vmem_cap = _vmem_capacity_bytes()
    budget = int(vmem_cap * 0.7)                    # leave compiler headroom
    tb = (_pick_batch_tile(B, N, M, Vp, Dp, budget, tbytes)
          if batch_tile is None else batch_tile)
    assert B % tb == 0, "batch tile must divide the batch"

    G = B // tb
    C, R = tb * N, tb * M

    # Padded table in bf16 (exact 0/1 one-hot => the gather is bf16-lossless).
    w = jnp.pad(weight, ((0, Vp - V), (0, Dp - D))).astype(table_dtype)

    idx = input_ids.astype(jnp.int32).reshape(B * N, 1)
    psw = per_sample_weights.astype(jnp.float32).reshape(G, 1, C)

    # End-of-bag / previous-end offsets, rebased to tile-local column indices.
    off = offsets.astype(jnp.int32)
    prev = jnp.concatenate(
        [jnp.full((B, 1), -1, jnp.int32), off[:, :-1]], axis=1)
    base = ((jnp.arange(B, dtype=jnp.int32) % tb) * N)[:, None]
    hi = (off + base).reshape(B * M, 1)
    lo = (prev + base).reshape(B * M, 1)

    footprint = _footprint_bytes(C, R, Vp, Dp, tbytes)
    vmem_limit = int(min(vmem_cap, max(32 << 20, 2 * footprint + (4 << 20))))

    cost = pl.CostEstimate(
        flops=G * (2 * C * Vp * Dp + 2 * R * C * Dp),
        transcendentals=0,
        bytes_accessed=(Vp * Dp * tbytes + B * N * 8 + 2 * B * M * 4
                        + B * M * Dp * 4))

    out = pl.pallas_call(
        _weighted_embedding_bag_kernel,
        out_shape=jax.ShapeDtypeStruct((B * M, Dp), jnp.float32),
        grid_spec=pltpu.PrefetchScalarGridSpec(
            num_scalar_prefetch=0,
            grid=(G,),
            in_specs=[
                pl.BlockSpec((C, 1), lambda g: (g, 0)),        # embedding ids
                pl.BlockSpec((1, 1, C), lambda g: (g, 0, 0)),  # psw (lane-dense row)
                pl.BlockSpec((R, 1), lambda g: (g, 0)),        # lo (prev end)
                pl.BlockSpec((R, 1), lambda g: (g, 0)),        # hi (bag end)
                pl.BlockSpec((Vp, Dp), lambda g: (0, 0)),      # resident table
            ],
            out_specs=pl.BlockSpec((R, Dp), lambda g: (g, 0)),
        ),
        compiler_params=pltpu.CompilerParams(
            dimension_semantics=("parallel",),
            vmem_limit_bytes=vmem_limit),
        cost_estimate=cost,
    )(idx, psw, lo, hi, w)

    return out.reshape(B, M, Dp)[..., :D]


def reference(weight, input_ids, offsets, per_sample_weights):
    """Plain-JAX port of the PyTorch forward for verification."""
    emb = jnp.take(weight, input_ids, axis=0)                        # (B, N, D)
    wemb = emb * per_sample_weights[..., None]
    padded = jnp.pad(wemb, ((0, 0), (1, 0), (0, 0)))
    csum = jnp.cumsum(padded, axis=1)                                # (B, N+1, D)
    poff = jnp.pad(offsets, ((0, 0), (1, 0)), constant_values=-1) + 1
    end = jnp.take_along_axis(csum, poff[:, 1:, None], axis=1)
    start = jnp.take_along_axis(csum, poff[:, :-1, None], axis=1)
    return end - start


if __name__ == "__main__":
    B, N, M = 2, 8, 4          # batch, indices-per-sample, bags-per-sample
    V, D = 16, 32              # num_embeddings, embedding_dim

    key = jax.random.PRNGKey(0)
    kw, ki, kp = jax.random.split(key, 3)

    # Deterministic parameter init (matches torch.nn.init.normal_ semantics).
    weight = jax.random.normal(kw, (V, D), dtype=jnp.float32)

    input_ids = jax.random.randint(ki, (B, N), 0, V, dtype=jnp.int32)
    per_sample_weights = jax.random.uniform(kp, (B, N), dtype=jnp.float32)
    # End-of-bag indices (monotonic, last bag ends at N-1).
    offsets = jnp.array([[1, 3, 5, 7],
                         [0, 2, 4, 7]], dtype=jnp.int32)

    out = weighted_embedding_bag(weight, input_ids, offsets, per_sample_weights)
    out = jax.block_until_ready(out)
    assert out.shape == (B, M, D)

    # Exact-logic check: same bf16-quantized table as the kernel uses.
    ref_bf16 = reference(weight.astype(jnp.bfloat16).astype(jnp.float32),
                         input_ids, offsets, per_sample_weights)
    assert jnp.allclose(out, ref_bf16, atol=1e-4, rtol=1e-4), "kernel logic mismatch"

    # End-to-end check vs the full-f32 PyTorch-equivalent reference
    # (tolerance covers the bf16 rounding of the table entries).
    ref_f32 = reference(weight, input_ids, offsets, per_sample_weights)
    assert jnp.allclose(out, ref_f32, atol=5e-2, rtol=5e-2), "mismatch vs f32 reference"

    print("KERNEL_OK")
</pallas_src>

<mosaic_0001>
module attributes {stable_mosaic.version = 11 : i64} {
  func.func @_weighted_embedding_bag_kernel(%arg0: i32, %arg1: memref<16x1xi32, #tpu.memory_space<vmem>>, %arg2: memref<1x1x16xf32, #tpu.memory_space<vmem>>, %arg3: memref<8x1xi32, #tpu.memory_space<vmem>>, %arg4: memref<8x1xi32, #tpu.memory_space<vmem>>, %arg5: memref<128x128xbf16, #tpu.memory_space<vmem>>, %arg6: memref<8x128xf32, #tpu.memory_space<vmem>>) attributes {dimension_semantics = [#tpu.dimension_semantics<parallel>], iteration_bounds = array<i64: 1>, scalar_prefetch = 0 : i64, scratch_operands = 0 : i64, tpu.core_type = #tpu.core_type<tc>, window_params = [{transform_indices = @transform_0, window_bounds = array<i64: 16, 1>}, {transform_indices = @transform_1, window_bounds = array<i64: 1, 1, 16>}, {transform_indices = @transform_2, window_bounds = array<i64: 8, 1>}, {transform_indices = @transform_3, window_bounds = array<i64: 8, 1>}, {pipeline_mode = #tpu.pipeline_mode<synchronous>, transform_indices = @transform_4, window_bounds = array<i64: 128, 128>}, {transform_indices = @transform_5, window_bounds = array<i64: 8, 128>}]} {
    %c0 = arith.constant 0 : index
    %c0_0 = arith.constant 0 : index
    %0 = vector.load %arg1[%c0, %c0_0] : memref<16x1xi32, #tpu.memory_space<vmem>>, vector<16x1xi32>
    %c0_1 = arith.constant 0 : index
    %c0_2 = arith.constant 0 : index
    %c0_3 = arith.constant 0 : index
    %1 = vector.load %arg2[%c0_1, %c0_2, %c0_3] : memref<1x1x16xf32, #tpu.memory_space<vmem>>, vector<1x1x16xf32>
    %2 = vector.shape_cast %1 : vector<1x1x16xf32> to vector<1x16xf32>
    %c0_4 = arith.constant 0 : index
    %c0_5 = arith.constant 0 : index
    %3 = vector.load %arg3[%c0_4, %c0_5] : memref<8x1xi32, #tpu.memory_space<vmem>>, vector<8x1xi32>
    %c0_6 = arith.constant 0 : index
    %c0_7 = arith.constant 0 : index
    %4 = vector.load %arg4[%c0_6, %c0_7] : memref<8x1xi32, #tpu.memory_space<vmem>>, vector<8x1xi32>
    %5 = tpu.iota {dimensions = array<i32: 1>} : vector<16x128xi32>
    %6 = vector.broadcast %0 : vector<16x1xi32> to vector<16x128xi32>
    %7 = arith.cmpi eq, %5, %6 : vector<16x128xi32>
    %8 = arith.extui %7 : vector<16x128xi1> to vector<16x128xi32>
    %9 = arith.sitofp %8 : vector<16x128xi32> to vector<16x128xf32>
    %10 = arith.truncf %9 : vector<16x128xf32> to vector<16x128xbf16>
    %c0_8 = arith.constant 0 : index
    %c0_9 = arith.constant 0 : index
    %11 = vector.load %arg5[%c0_8, %c0_9] : memref<128x128xbf16, #tpu.memory_space<vmem>>, vector<128x128xbf16>
    %cst = arith.constant dense<0.000000e+00> : vector<16x128xf32>
    %12 = tpu.matmul %10, %11, %cst {dimension_numbers = #tpu.dot_dimension_numbers<[1], [0], [0], [1], [0, 0, 1, 1], [], []>} : vector<16x128xbf16>, vector<128x128xbf16>, vector<16x128xf32> -> vector<16x128xf32>
    %13 = tpu.iota {dimensions = array<i32: 1>} : vector<8x16xi32>
    %14 = vector.broadcast %3 : vector<8x1xi32> to vector<8x16xi32>
    %15 = arith.cmpi sgt, %13, %14 : vector<8x16xi32>
    %16 = vector.broadcast %4 : vector<8x1xi32> to vector<8x16xi32>
    %17 = arith.cmpi sle, %13, %16 : vector<8x16xi32>
    %18 = arith.andi %15, %17 : vector<8x16xi1>
    %cst_10 = arith.constant 0.000000e+00 : f32
    %19 = vector.shape_cast %2 : vector<1x16xf32> to vector<1x16xf32>
    %20 = vector.broadcast %19 : vector<1x16xf32> to vector<8x16xf32>
    %21 = vector.broadcast %cst_10 : f32 to vector<8x16xf32>
    %22 = arith.select %18, %20, %21 : vector<8x16xi1>, vector<8x16xf32>
    %cst_11 = arith.constant dense<0.000000e+00> : vector<8x128xf32>
    %23 = tpu.matmul %22, %12, %cst_11 {dimension_numbers = #tpu.dot_dimension_numbers<[1], [0], [0], [1], [0, 0, 1, 1], [], []>} : vector<8x16xf32>, vector<16x128xf32>, vector<8x128xf32> -> vector<8x128xf32>
    %c0_12 = arith.constant 0 : index
    %c0_13 = arith.constant 0 : index
    %24 = vector.load %arg6[%c0_12, %c0_13] : memref<8x128xf32, #tpu.memory_space<vmem>>, vector<8x128xf32>
    tpu.vector_store %arg6[%c0_12, %c0_13], %23 {strides = array<i32>} : memref<8x128xf32, #tpu.memory_space<vmem>>, vector<8x128xf32>,
    return
  }
  func.func @transform_0(%arg0: i32) -> (i32, i32) {
    %c0_i32 = arith.constant 0 : i32
    %c0_i32_0 = arith.constant 0 : i32
    return %arg0, %c0_i32 : i32, i32
  }
  func.func @transform_1(%arg0: i32) -> (i32, i32, i32) {
    %c0_i32 = arith.constant 0 : i32
    %c0_i32_0 = arith.constant 0 : i32
    %c0_i32_1 = arith.constant 0 : i32
    return %arg0, %c0_i32, %c0_i32_0 : i32, i32, i32
  }
  func.func @transform_2(%arg0: i32) -> (i32, i32) {
    %c0_i32 = arith.constant 0 : i32
    %c0_i32_0 = arith.constant 0 : i32
    return %arg0, %c0_i32 : i32, i32
  }
  func.func @transform_3(%arg0: i32) -> (i32, i32) {
    %c0_i32 = arith.constant 0 : i32
    %c0_i32_0 = arith.constant 0 : i32
    return %arg0, %c0_i32 : i32, i32
  }
  func.func @transform_4(%arg0: i32) -> (i32, i32) {
    %c0_i32 = arith.constant 0 : i32
    %c0_i32_0 = arith.constant 0 : i32
    %c0_i32_1 = arith.constant 0 : i32
    return %c0_i32, %c0_i32_0 : i32, i32
  }
  func.func @transform_5(%arg0: i32) -> (i32, i32) {
    %c0_i32 = arith.constant 0 : i32
    %c0_i32_0 = arith.constant 0 : i32
    return %arg0, %c0_i32 : i32, i32
  }
}

</mosaic_0001>

<bundles_post_ra>
// kernel: tpu_custom_call.1
= control target key start
LH: loop header
LB: loop body
LE: loop exit
PB: predicated region body
PF: predicated region fallthrough
CT: control target
= control target key end

     0   :  { %10 = vsyncpa [#allocation3], 0  ;;  %s353_s0 = inlined_call_operand.vmem [shape: s32[16,1], index: 0, kind: input, shape index: {}]   ;;  %s354_s1 = inlined_call_operand.vmem [shape: f32[1,1,16], index: 1, kind: input, shape index: {}]   ;;  %s355_s2 = inlined_call_operand.vmem [shape: s32[8,1], index: 2, kind: input, shape index: {}]   ;;  %s356_s3 = inlined_call_operand.vmem [shape: s32[8,1], index: 3, kind: input, shape index: {}]   ;;  %s357_s4 = inlined_call_operand.hbm [shape: bf16[128,128], index: 4, kind: input, shape index: {}]   ;;  %s358_s5 = inlined_call_operand.hbm [shape: f32[8,128], index: 5, kind: output, shape index: {}]  }
   0x1   :  { %11 = vsyncpa [#allocation4], 0  ;;  %s24_s20 = sshll.u32 %s357_s4, 4  ;;  %s296_s21 = smov [#allocation2]   ;;  %s25_s20 = int_to_ptr.hbm [resolvable:$true] %s24_s20 }
   0x2   :  { %s26_s22 = sshll.u32 %s296_s21, 4  ;;  %s297_s23 = smov 64   ;;  %s27_s22 = int_to_ptr.vmem [resolvable:$true] %s26_s22 }
   0x3   :  { %s298_s24 = smov 4  }
   0x4   :  { %32 = dma.hbm_to_vmem [thread:$0]  %s25_s20, 1024, %s27_s22, [#allocation3], %s297_s23, %s297_s23, %s298_s24  }
   0x5   :  { %292 = dma.done.wait [#allocation3], 1024  }
   0x6   :  { %293 = vsyncadd [#allocation3], 4294966272  ;;  %v299_v0 = vmov 0   ;;  %v37_v1 = vld [vmem:[%s353_s0] sm:$0xff]  ;;  %v234_v2 = vld [vmem:[#allocation2 + $0x38] sm:$0xff]  ;;  %v42_v14 = vlaneseq  ;;  %vm148_vm6 = vcmask 130048  }
   0x7   :  { %241 = vset.pattern.permute.xlu0 %v299_v0  ;;  %242 = vset.pattern.permute.xlu1 %v299_v0  ;;  %v233_v3 = vld [vmem:[#allocation2 + $0x30] sm:$0xff]  ;;  %v38_v4 = vld [vmem:[%s353_s0 + $0x8] sm:$0xff]  ;;  %v231_v6 = vld [vmem:[#allocation2 + $0x20] sm:$0xff]  ;;  %v300_v17 = vmov 1.0|1.0   ;;  %s180_s10 = sshll.u32 %s358_s5, 4  ;;  %s181_s10 = int_to_ptr.hbm [resolvable:$true] %s180_s10 }
   0x8   :  { %45 = vperm.xlu0 %241, %v37_v1   ;;  %121 = vmatpush.bf16.msra.mxu0 %v234_v2  ;;  %v232_v5 = vld [vmem:[#allocation2 + $0x28] sm:$0xff]  ;;  %v230_v7 = vld [vmem:[#allocation2 + $0x18] sm:$0xff]  ;;  %v229_v8 = vld [vmem:[#allocation2 + $0x10] sm:$0xff]  ;;  %v43_v15 = vand.u32 127, %v42_v14 }
   0x9   :  { %v228_v9 = vld [vmem:[#allocation2 + $0x8] sm:$0xff]  ;;  %v227_v10 = vld [vmem:[#allocation2] sm:$0xff] }
   0xa   :  { %v40_v11 = vld [vmem:[%s355_s2] sm:$0xff] }
   0xb   :  { %136 = vperm.xlu1 %242, %v40_v11   ;;  %v41_v12 = vld [vmem:[%s356_s3] sm:$0xff]  ;;  %s301_s3 = smov [#allocation5]  }
   0xc   :  { %122 = vmatpush.bf16.msra.mxu0 %v233_v3  ;;  %v243_v21 = vld [vmem:[%s354_s1] ss:$0 sm:$0xff]  ;;  %s178_s7 = sshll.u32 %s301_s3, 4  ;;  %s179_s7 = int_to_ptr.vmem [resolvable:$true] %s178_s7 }
  0x10   :  { %48 = vperm.xlu0 %241, %v38_v4   ;;  %123 = vmatpush.bf16.msra.mxu0 %v232_v5 }
  0x13   :  { %140 = vperm.xlu1 %242, %v41_v12  }
  0x14   :  { %124 = vmatpush.bf16.msra.mxu0 %v231_v6 }
  0x18   :  { %125 = vmatpush.bf16.msra.mxu0 %v230_v7 }
  0x1c   :  { %126 = vmatpush.bf16.msra.mxu0 %v229_v8 }
  0x20   :  { %127 = vmatpush.bf16.msra.mxu0 %v228_v9 }
  0x24   :  { %128 = vmatpush.bf16.msra.mxu0 %v227_v10 }
  0x7a   :  { %v46_v13 = vpop.permute.xlu0 %45 }
  0x7b   :  { %vm50_vm0 = vcmp.eq.s32.totalorder %v43_v15, %v46_v13 }
  0x7d   :  { %v137_v18 = vpop.permute.xlu1 %136 }
  0x7e   :  { %vm138_vm3 = vcmp.gt.s32.totalorder %v43_v15, %v137_v18 }
  0x82   :  { %v49_v16 = vpop.permute.xlu0 %48 }
  0x83   :  { %vm51_vm1 = vcmp.eq.s32.totalorder %v43_v15, %v49_v16 }
  0x84   :  { %vm224_vm2 = vmpackc.low %vm51_vm1, %vm50_vm0 }
  0x85   :  { %225 = vmatmul.msk.bf16.vlgmr.msra.gmra.mxu0 %vm224_vm2, %v300_v17  ;;  %v141_v20 = vpop.permute.xlu1 %140 }
  0x86   :  { %vm142_vm4 = vcmp.le.s32.totalorder %v43_v15, %v141_v20 }
  0x87   :  { %vm143_vm5 = vmand %vm138_vm3, %vm142_vm4 }
  0x88   :  { %v147_v23 = vsel %vm143_vm5, %v243_v21, 0.0 }
 0x102   :  { %v130_v19 = vpop.f32.mrf.mxu0 }
 0x10a   :  { %v132_v22 = vpop.f32.mrf.mxu0 }
 0x10b   :  { %166 = vmatpush.msra.mxu1 %v132_v22 }
 0x10d   :  { %167 = vmatpush.msra.mxu1 %v130_v19 }
 0x10e   :  { %226 = vmatmul.msk.f32.vlgmr.msra.gmra.mxu1 %vm148_vm6, %v147_v23 }
 0x18b   :  { %v169_v24 = vpop.f32.mrf.mxu1 }
 0x18c   :  { %172 = vst [vmem:[#allocation5] sm:$0xff] %v169_v24 }
 0x18d   :  { %183 = dma.vmem_to_hbm [thread:$0]  %s179_s7, 128, %s181_s10, [#allocation4]  }
 0x18e   :  { %294 = dma.done.wait [#allocation4], 128  }
 0x18f   :  { %295 = vsyncadd [#allocation4], 4294967168 }
 0x190   :  { %188 = vsyncpa [#allocation3], 1 }
 0x191   :  { %189 = vsyncpa [#allocation4], 1 }

</bundles_post_ra>
